<compile_context>
chip_gen: v5e
topology: v5e:2x2
jax: 0.10.0
libtpu: 0.0.40
codegen_flags: <defaults>
</compile_context>

<pallas_src>
import jax
import jax.numpy as jnp
from jax.experimental import pallas as pl
from jax.experimental.pallas import tpu as pltpu


def _temporal_compressor_kernel(ti_ref, w1_ref, b1_ref, w2e_ref, x_ref, o_ref):
    # ti_ref  : (BB, S, T)    temporal info for this batch block
    # w1_ref  : (T, Kp)       conv1 weight, augmented (column C feeds the ones
    #                         channel that carries conv2's bias), zero-padded to Kp
    # b1_ref  : (1, Kp)       conv1 bias, augmented (entry C is 1.0)
    # w2e_ref : (Kp, CHW)     conv2 weight spatially expanded over HW, with the
    #                         conv2 bias stacked as row C and 1/S folded in
    # x_ref   : (BB, S, CHW)
    # o_ref   : (BB, CHW)
    BB, S, T = ti_ref.shape
    CHW = x_ref.shape[-1]

    w1 = w1_ref[...]
    b1 = b1_ref[...]
    w2e = w2e_ref[...]

    # Statically unrolled loop over S (S is small). Per step only (BB, CHW)
    # values are live; the two tiny matmuls are free MXU filler under the
    # HBM-bound x stream.
    acc = jnp.zeros((BB, CHW), jnp.float32)
    for s in range(S):
        ti_s = ti_ref[:, s, :].astype(jnp.float32)                         # (BB, T)
        e1_s = jnp.maximum(
            jnp.dot(ti_s, w1, preferred_element_type=jnp.float32) + b1, 0.0)
        e2_s = jnp.dot(e1_s, w2e, preferred_element_type=jnp.float32)      # (BB, CHW)
        acc = acc + x_ref[:, s, :].astype(jnp.float32) * e2_s
    o_ref[...] = acc.astype(o_ref.dtype)


def _choose_block_b(B, S, CHW, itemsize, target_tile_bytes=6 * 1024 * 1024):
    """Pick the batch block size.

    Policy (from perf review):
      * Aim for the largest x tile <= ~6 MiB (with the S-loop restructure the
        in-kernel live set is ~2.5x the tile, comfortably inside an explicit
        ~48 MiB scoped-VMEM limit on every generation).
      * Only shrink the tile to get an even >=4-step grid (v7x megacore + per-TC
        pipelining) if the tile stays >= ~1 MiB; on single-TC v5e/v6e bigger
        tiles / fewer steps is the whole story.
      * If the block does not span the whole batch, keep it a multiple of 8 so
        the 2-D (block_b, CHW) output block is sublane-aligned (batch is padded
        in the wrapper instead of collapsing to tiny tiles).
    """
    per_b = max(1, S * CHW * itemsize)
    bb = max(1, min(B, target_tile_bytes // per_b))
    if B // bb < 4 and B >= 4 and (B // 4) * per_b >= (1 << 20):
        bb = max(1, B // 4)
    if bb < B:
        bb = (bb // 8) * 8 if bb >= 8 else min(B, 8)
        bb = min(bb, B)
    return bb


def temporal_compressor(x, temporal_info, w1, b1, w2, b2, *, block_b=None,
                        vmem_limit_bytes=48 * 1024 * 1024):
    """x: (B, S, C, H, W), temporal_info: (B, S, T).
    w1: (T, C), b1: (C,), w2: (C, C), b2: (C,)  (weights stored in->out).
    Returns (B, C, H, W) = mean_S( x * broadcast(conv2(relu(conv1(ti)))) )."""
    B, S, C, H, W = x.shape
    T = temporal_info.shape[-1]
    HW = H * W
    CHW = C * HW

    # Lane-dense x layout: flatten (C, H, W) into the trailing (lane) dim.
    x_flat = x.reshape(B, S, CHW)

    # ---- Parameter prep (tiny one-time host/XLA cost) ----------------------
    # Augmented K = C channels + 1 ones-channel (carries conv2's bias through
    # the second matmul), zero-padded up to a multiple of 8.
    Kp = ((C + 1 + 7) // 8) * 8
    inv_s = jnp.float32(1.0 / S)

    w1_aug = jnp.zeros((T, Kp), jnp.float32).at[:, :C].set(w1.astype(jnp.float32))
    b1_aug = (jnp.zeros((1, Kp), jnp.float32)
              .at[0, :C].set(b1.astype(jnp.float32))
              .at[0, C].set(1.0))                     # relu(0 + 1) == 1 -> ones channel

    w2e = jnp.repeat(w2.astype(jnp.float32), HW, axis=1)        # (C, CHW)
    b2e = jnp.repeat(b2.astype(jnp.float32), HW)                # (CHW,)
    w2e_aug = (jnp.zeros((Kp, CHW), jnp.float32)
               .at[:C, :].set(w2e)
               .at[C, :].set(b2e)) * inv_s            # fold mean's 1/S

    # ---- Tiling policy ------------------------------------------------------
    if block_b is None:
        block_b = _choose_block_b(B, S, CHW, jnp.dtype(x.dtype).itemsize)
    grid_b = pl.cdiv(B, block_b)
    B_pad = grid_b * block_b
    if B_pad != B:
        pad = B_pad - B
        x_flat = jnp.pad(x_flat, ((0, pad), (0, 0), (0, 0)))
        temporal_info = jnp.pad(temporal_info, ((0, pad), (0, 0), (0, 0)))

    out = pl.pallas_call(
        _temporal_compressor_kernel,
        out_shape=jax.ShapeDtypeStruct((B_pad, CHW), x.dtype),
        grid_spec=pltpu.PrefetchScalarGridSpec(
            num_scalar_prefetch=0,
            grid=(grid_b,),
            in_specs=[
                pl.BlockSpec((block_b, S, T), lambda b: (b, 0, 0)),    # temporal_info
                pl.BlockSpec((T, Kp), lambda b: (0, 0)),               # w1 (augmented)
                pl.BlockSpec((1, Kp), lambda b: (0, 0)),               # b1 (augmented)
                pl.BlockSpec((Kp, CHW), lambda b: (0, 0)),             # w2 expanded + bias row
                pl.BlockSpec((block_b, S, CHW), lambda b: (b, 0, 0)),  # x (lane-dense)
            ],
            out_specs=pl.BlockSpec((block_b, CHW), lambda b: (b, 0)),
        ),
        compiler_params=pltpu.CompilerParams(
            dimension_semantics=("parallel",),
            vmem_limit_bytes=vmem_limit_bytes),
    )(temporal_info, w1_aug, b1_aug, w2e_aug, x_flat)

    return out[:B].reshape(B, C, H, W)


def _reference(x, temporal_info, w1, b1, w2, b2):
    # Pure-JAX reference mirroring the PyTorch forward.
    hp = jax.lax.Precision.HIGHEST
    e1 = jnp.maximum(
        jnp.einsum('bst,tc->bsc', temporal_info, w1, precision=hp) + b1, 0.0)
    e2 = jnp.einsum('bsc,cd->bsd', e1, w2, precision=hp) + b2        # (B, S, C)
    xm = x * e2[:, :, :, None, None]
    return xm.mean(axis=1)


if __name__ == "__main__":
    B, S, C, H, W = 2, 8, 4, 16, 16
    T = 32  # temporal_dim

    key = jax.random.PRNGKey(0)
    k_x, k_ti, k_w1, k_b1, k_w2, k_b2 = jax.random.split(key, 6)

    x = jax.random.normal(k_x, (B, S, C, H, W), dtype=jnp.float32)
    temporal_info = jax.random.normal(k_ti, (B, S, T), dtype=jnp.float32)

    # Weights stored (in, out); transpose+squeeze if importing PyTorch Conv1d.
    w1 = jax.random.normal(k_w1, (T, C), dtype=jnp.float32) * 0.1
    b1 = jax.random.normal(k_b1, (C,), dtype=jnp.float32) * 0.1
    w2 = jax.random.normal(k_w2, (C, C), dtype=jnp.float32) * 0.1
    b2 = jax.random.normal(k_b2, (C,), dtype=jnp.float32) * 0.1

    out = temporal_compressor(x, temporal_info, w1, b1, w2, b2)
    out = jax.block_until_ready(out)

    ref = _reference(x, temporal_info, w1, b1, w2, b2)
    assert out.shape == (B, C, H, W)
    assert jnp.allclose(out, ref, atol=1e-3, rtol=1e-3), (
        float(jnp.max(jnp.abs(out - ref))))

    print("KERNEL_OK")
</pallas_src>

<mosaic_0001>
module attributes {stable_mosaic.version = 11 : i64} {
  func.func @_temporal_compressor_kernel(%arg0: i32, %arg1: memref<2x8x32xf32, #tpu.memory_space<vmem>>, %arg2: memref<32x8xf32, #tpu.memory_space<vmem>>, %arg3: memref<1x8xf32, #tpu.memory_space<vmem>>, %arg4: memref<8x1024xf32, #tpu.memory_space<vmem>>, %arg5: memref<2x8x1024xf32, #tpu.memory_space<vmem>>, %arg6: memref<2x1024xf32, #tpu.memory_space<vmem>>) attributes {dimension_semantics = [#tpu.dimension_semantics<parallel>], iteration_bounds = array<i64: 1>, scalar_prefetch = 0 : i64, scratch_operands = 0 : i64, tpu.core_type = #tpu.core_type<tc>, window_params = [{transform_indices = @transform_0, window_bounds = array<i64: 2, 8, 32>}, {pipeline_mode = #tpu.pipeline_mode<synchronous>, transform_indices = @transform_1, window_bounds = array<i64: 32, 8>}, {pipeline_mode = #tpu.pipeline_mode<synchronous>, transform_indices = @transform_2, window_bounds = array<i64: 1, 8>}, {pipeline_mode = #tpu.pipeline_mode<synchronous>, transform_indices = @transform_3, window_bounds = array<i64: 8, 1024>}, {transform_indices = @transform_4, window_bounds = array<i64: 2, 8, 1024>}, {transform_indices = @transform_5, window_bounds = array<i64: 2, 1024>}]} {
    %c0 = arith.constant 0 : index
    %c0_0 = arith.constant 0 : index
    %0 = vector.load %arg2[%c0, %c0_0] : memref<32x8xf32, #tpu.memory_space<vmem>>, vector<32x8xf32>
    %c0_1 = arith.constant 0 : index
    %c0_2 = arith.constant 0 : index
    %1 = vector.load %arg3[%c0_1, %c0_2] : memref<1x8xf32, #tpu.memory_space<vmem>>, vector<1x8xf32>
    %c0_3 = arith.constant 0 : index
    %c0_4 = arith.constant 0 : index
    %2 = vector.load %arg4[%c0_3, %c0_4] : memref<8x1024xf32, #tpu.memory_space<vmem>>, vector<8x1024xf32>
    %cst = arith.constant 0.000000e+00 : f32
    %3 = vector.broadcast %cst : f32 to vector<2x1024xf32>
    %c0_5 = arith.constant 0 : index
    %c0_6 = arith.constant 0 : index
    %c0_7 = arith.constant 0 : index
    %4 = vector.load %arg1[%c0_5, %c0_6, %c0_7] : memref<2x8x32xf32, #tpu.memory_space<vmem>>, vector<2x1x32xf32>
    %5 = vector.shape_cast %4 : vector<2x1x32xf32> to vector<2x32xf32>
    %cst_8 = arith.constant dense<0.000000e+00> : vector<2x8xf32>
    %6 = tpu.matmul %5, %0, %cst_8 {dimension_numbers = #tpu.dot_dimension_numbers<[1], [0], [0], [1], [0, 0, 1, 1], [], []>} : vector<2x32xf32>, vector<32x8xf32>, vector<2x8xf32> -> vector<2x8xf32>
    %7 = vector.broadcast %1 : vector<1x8xf32> to vector<2x8xf32>
    %8 = arith.addf %6, %7 : vector<2x8xf32>
    %cst_9 = arith.constant 0.000000e+00 : f32
    %9 = vector.broadcast %cst_9 : f32 to vector<2x8xf32>
    %10 = arith.maximumf %8, %9 : vector<2x8xf32>
    %cst_10 = arith.constant dense<0.000000e+00> : vector<2x1024xf32>
    %11 = tpu.matmul %10, %2, %cst_10 {dimension_numbers = #tpu.dot_dimension_numbers<[1], [0], [0], [1], [0, 0, 1, 1], [], []>} : vector<2x8xf32>, vector<8x1024xf32>, vector<2x1024xf32> -> vector<2x1024xf32>
    %c0_11 = arith.constant 0 : index
    %c0_12 = arith.constant 0 : index
    %c0_13 = arith.constant 0 : index
    %12 = vector.load %arg5[%c0_11, %c0_12, %c0_13] : memref<2x8x1024xf32, #tpu.memory_space<vmem>>, vector<2x1x1024xf32>
    %13 = vector.shape_cast %12 : vector<2x1x1024xf32> to vector<2x1024xf32>
    %14 = arith.mulf %13, %11 : vector<2x1024xf32>
    %15 = arith.addf %3, %14 : vector<2x1024xf32>
    %c0_14 = arith.constant 0 : index
    %c1 = arith.constant 1 : index
    %c0_15 = arith.constant 0 : index
    %16 = vector.load %arg1[%c0_14, %c1, %c0_15] : memref<2x8x32xf32, #tpu.memory_space<vmem>>, vector<2x1x32xf32>
    %17 = vector.shape_cast %16 : vector<2x1x32xf32> to vector<2x32xf32>
    %cst_16 = arith.constant dense<0.000000e+00> : vector<2x8xf32>
    %18 = tpu.matmul %17, %0, %cst_16 {dimension_numbers = #tpu.dot_dimension_numbers<[1], [0], [0], [1], [0, 0, 1, 1], [], []>} : vector<2x32xf32>, vector<32x8xf32>, vector<2x8xf32> -> vector<2x8xf32>
    %19 = vector.broadcast %1 : vector<1x8xf32> to vector<2x8xf32>
    %20 = arith.addf %18, %19 : vector<2x8xf32>
    %cst_17 = arith.constant 0.000000e+00 : f32
    %21 = vector.broadcast %cst_17 : f32 to vector<2x8xf32>
    %22 = arith.maximumf %20, %21 : vector<2x8xf32>
    %cst_18 = arith.constant dense<0.000000e+00> : vector<2x1024xf32>
    %23 = tpu.matmul %22, %2, %cst_18 {dimension_numbers = #tpu.dot_dimension_numbers<[1], [0], [0], [1], [0, 0, 1, 1], [], []>} : vector<2x8xf32>, vector<8x1024xf32>, vector<2x1024xf32> -> vector<2x1024xf32>
    %c0_19 = arith.constant 0 : index
    %c1_20 = arith.constant 1 : index
    %c0_21 = arith.constant 0 : index
    %24 = vector.load %arg5[%c0_19, %c1_20, %c0_21] : memref<2x8x1024xf32, #tpu.memory_space<vmem>>, vector<2x1x1024xf32>
    %25 = vector.shape_cast %24 : vector<2x1x1024xf32> to vector<2x1024xf32>
    %26 = arith.mulf %25, %23 : vector<2x1024xf32>
    %27 = arith.addf %15, %26 : vector<2x1024xf32>
    %c0_22 = arith.constant 0 : index
    %c2 = arith.constant 2 : index
    %c0_23 = arith.constant 0 : index
    %28 = vector.load %arg1[%c0_22, %c2, %c0_23] : memref<2x8x32xf32, #tpu.memory_space<vmem>>, vector<2x1x32xf32>
    %29 = vector.shape_cast %28 : vector<2x1x32xf32> to vector<2x32xf32>
    %cst_24 = arith.constant dense<0.000000e+00> : vector<2x8xf32>
    %30 = tpu.matmul %29, %0, %cst_24 {dimension_numbers = #tpu.dot_dimension_numbers<[1], [0], [0], [1], [0, 0, 1, 1], [], []>} : vector<2x32xf32>, vector<32x8xf32>, vector<2x8xf32> -> vector<2x8xf32>
    %31 = vector.broadcast %1 : vector<1x8xf32> to vector<2x8xf32>
    %32 = arith.addf %30, %31 : vector<2x8xf32>
    %cst_25 = arith.constant 0.000000e+00 : f32
    %33 = vector.broadcast %cst_25 : f32 to vector<2x8xf32>
    %34 = arith.maximumf %32, %33 : vector<2x8xf32>
    %cst_26 = arith.constant dense<0.000000e+00> : vector<2x1024xf32>
    %35 = tpu.matmul %34, %2, %cst_26 {dimension_numbers = #tpu.dot_dimension_numbers<[1], [0], [0], [1], [0, 0, 1, 1], [], []>} : vector<2x8xf32>, vector<8x1024xf32>, vector<2x1024xf32> -> vector<2x1024xf32>
    %c0_27 = arith.constant 0 : index
    %c2_28 = arith.constant 2 : index
    %c0_29 = arith.constant 0 : index
    %36 = vector.load %arg5[%c0_27, %c2_28, %c0_29] : memref<2x8x1024xf32, #tpu.memory_space<vmem>>, vector<2x1x1024xf32>
    %37 = vector.shape_cast %36 : vector<2x1x1024xf32> to vector<2x1024xf32>
    %38 = arith.mulf %37, %35 : vector<2x1024xf32>
    %39 = arith.addf %27, %38 : vector<2x1024xf32>
    %c0_30 = arith.constant 0 : index
    %c3 = arith.constant 3 : index
    %c0_31 = arith.constant 0 : index
    %40 = vector.load %arg1[%c0_30, %c3, %c0_31] : memref<2x8x32xf32, #tpu.memory_space<vmem>>, vector<2x1x32xf32>
    %41 = vector.shape_cast %40 : vector<2x1x32xf32> to vector<2x32xf32>
    %cst_32 = arith.constant dense<0.000000e+00> : vector<2x8xf32>
    %42 = tpu.matmul %41, %0, %cst_32 {dimension_numbers = #tpu.dot_dimension_numbers<[1], [0], [0], [1], [0, 0, 1, 1], [], []>} : vector<2x32xf32>, vector<32x8xf32>, vector<2x8xf32> -> vector<2x8xf32>
    %43 = vector.broadcast %1 : vector<1x8xf32> to vector<2x8xf32>
    %44 = arith.addf %42, %43 : vector<2x8xf32>
    %cst_33 = arith.constant 0.000000e+00 : f32
    %45 = vector.broadcast %cst_33 : f32 to vector<2x8xf32>
    %46 = arith.maximumf %44, %45 : vector<2x8xf32>
    %cst_34 = arith.constant dense<0.000000e+00> : vector<2x1024xf32>
    %47 = tpu.matmul %46, %2, %cst_34 {dimension_numbers = #tpu.dot_dimension_numbers<[1], [0], [0], [1], [0, 0, 1, 1], [], []>} : vector<2x8xf32>, vector<8x1024xf32>, vector<2x1024xf32> -> vector<2x1024xf32>
    %c0_35 = arith.constant 0 : index
    %c3_36 = arith.constant 3 : index
    %c0_37 = arith.constant 0 : index
    %48 = vector.load %arg5[%c0_35, %c3_36, %c0_37] : memref<2x8x1024xf32, #tpu.memory_space<vmem>>, vector<2x1x1024xf32>
    %49 = vector.shape_cast %48 : vector<2x1x1024xf32> to vector<2x1024xf32>
    %50 = arith.mulf %49, %47 : vector<2x1024xf32>
    %51 = arith.addf %39, %50 : vector<2x1024xf32>
    %c0_38 = arith.constant 0 : index
    %c4 = arith.constant 4 : index
    %c0_39 = arith.constant 0 : index
    %52 = vector.load %arg1[%c0_38, %c4, %c0_39] : memref<2x8x32xf32, #tpu.memory_space<vmem>>, vector<2x1x32xf32>
    %53 = vector.shape_cast %52 : vector<2x1x32xf32> to vector<2x32xf32>
    %cst_40 = arith.constant dense<0.000000e+00> : vector<2x8xf32>
    %54 = tpu.matmul %53, %0, %cst_40 {dimension_numbers = #tpu.dot_dimension_numbers<[1], [0], [0], [1], [0, 0, 1, 1], [], []>} : vector<2x32xf32>, vector<32x8xf32>, vector<2x8xf32> -> vector<2x8xf32>
    %55 = vector.broadcast %1 : vector<1x8xf32> to vector<2x8xf32>
    %56 = arith.addf %54, %55 : vector<2x8xf32>
    %cst_41 = arith.constant 0.000000e+00 : f32
    %57 = vector.broadcast %cst_41 : f32 to vector<2x8xf32>
    %58 = arith.maximumf %56, %57 : vector<2x8xf32>
    %cst_42 = arith.constant dense<0.000000e+00> : vector<2x1024xf32>
    %59 = tpu.matmul %58, %2, %cst_42 {dimension_numbers = #tpu.dot_dimension_numbers<[1], [0], [0], [1], [0, 0, 1, 1], [], []>} : vector<2x8xf32>, vector<8x1024xf32>, vector<2x1024xf32> -> vector<2x1024xf32>
    %c0_43 = arith.constant 0 : index
    %c4_44 = arith.constant 4 : index
    %c0_45 = arith.constant 0 : index
    %60 = vector.load %arg5[%c0_43, %c4_44, %c0_45] : memref<2x8x1024xf32, #tpu.memory_space<vmem>>, vector<2x1x1024xf32>
    %61 = vector.shape_cast %60 : vector<2x1x1024xf32> to vector<2x1024xf32>
    %62 = arith.mulf %61, %59 : vector<2x1024xf32>
    %63 = arith.addf %51, %62 : vector<2x1024xf32>
    %c0_46 = arith.constant 0 : index
    %c5 = arith.constant 5 : index
    %c0_47 = arith.constant 0 : index
    %64 = vector.load %arg1[%c0_46, %c5, %c0_47] : memref<2x8x32xf32, #tpu.memory_space<vmem>>, vector<2x1x32xf32>
    %65 = vector.shape_cast %64 : vector<2x1x32xf32> to vector<2x32xf32>
    %cst_48 = arith.constant dense<0.000000e+00> : vector<2x8xf32>
    %66 = tpu.matmul %65, %0, %cst_48 {dimension_numbers = #tpu.dot_dimension_numbers<[1], [0], [0], [1], [0, 0, 1, 1], [], []>} : vector<2x32xf32>, vector<32x8xf32>, vector<2x8xf32> -> vector<2x8xf32>
    %67 = vector.broadcast %1 : vector<1x8xf32> to vector<2x8xf32>
    %68 = arith.addf %66, %67 : vector<2x8xf32>
    %cst_49 = arith.constant 0.000000e+00 : f32
    %69 = vector.broadcast %cst_49 : f32 to vector<2x8xf32>
    %70 = arith.maximumf %68, %69 : vector<2x8xf32>
    %cst_50 = arith.constant dense<0.000000e+00> : vector<2x1024xf32>
    %71 = tpu.matmul %70, %2, %cst_50 {dimension_numbers = #tpu.dot_dimension_numbers<[1], [0], [0], [1], [0, 0, 1, 1], [], []>} : vector<2x8xf32>, vector<8x1024xf32>, vector<2x1024xf32> -> vector<2x1024xf32>
    %c0_51 = arith.constant 0 : index
    %c5_52 = arith.constant 5 : index
    %c0_53 = arith.constant 0 : index
    %72 = vector.load %arg5[%c0_51, %c5_52, %c0_53] : memref<2x8x1024xf32, #tpu.memory_space<vmem>>, vector<2x1x1024xf32>
    %73 = vector.shape_cast %72 : vector<2x1x1024xf32> to vector<2x1024xf32>
    %74 = arith.mulf %73, %71 : vector<2x1024xf32>
    %75 = arith.addf %63, %74 : vector<2x1024xf32>
    %c0_54 = arith.constant 0 : index
    %c6 = arith.constant 6 : index
    %c0_55 = arith.constant 0 : index
    %76 = vector.load %arg1[%c0_54, %c6, %c0_55] : memref<2x8x32xf32, #tpu.memory_space<vmem>>, vector<2x1x32xf32>
    %77 = vector.shape_cast %76 : vector<2x1x32xf32> to vector<2x32xf32>
    %cst_56 = arith.constant dense<0.000000e+00> : vector<2x8xf32>
    %78 = tpu.matmul %77, %0, %cst_56 {dimension_numbers = #tpu.dot_dimension_numbers<[1], [0], [0], [1], [0, 0, 1, 1], [], []>} : vector<2x32xf32>, vector<32x8xf32>, vector<2x8xf32> -> vector<2x8xf32>
    %79 = vector.broadcast %1 : vector<1x8xf32> to vector<2x8xf32>
    %80 = arith.addf %78, %79 : vector<2x8xf32>
    %cst_57 = arith.constant 0.000000e+00 : f32
    %81 = vector.broadcast %cst_57 : f32 to vector<2x8xf32>
    %82 = arith.maximumf %80, %81 : vector<2x8xf32>
    %cst_58 = arith.constant dense<0.000000e+00> : vector<2x1024xf32>
    %83 = tpu.matmul %82, %2, %cst_58 {dimension_numbers = #tpu.dot_dimension_numbers<[1], [0], [0], [1], [0, 0, 1, 1], [], []>} : vector<2x8xf32>, vector<8x1024xf32>, vector<2x1024xf32> -> vector<2x1024xf32>
    %c0_59 = arith.constant 0 : index
    %c6_60 = arith.constant 6 : index
    %c0_61 = arith.constant 0 : index
    %84 = vector.load %arg5[%c0_59, %c6_60, %c0_61] : memref<2x8x1024xf32, #tpu.memory_space<vmem>>, vector<2x1x1024xf32>
    %85 = vector.shape_cast %84 : vector<2x1x1024xf32> to vector<2x1024xf32>
    %86 = arith.mulf %85, %83 : vector<2x1024xf32>
    %87 = arith.addf %75, %86 : vector<2x1024xf32>
    %c0_62 = arith.constant 0 : index
    %c7 = arith.constant 7 : index
    %c0_63 = arith.constant 0 : index
    %88 = vector.load %arg1[%c0_62, %c7, %c0_63] : memref<2x8x32xf32, #tpu.memory_space<vmem>>, vector<2x1x32xf32>
    %89 = vector.shape_cast %88 : vector<2x1x32xf32> to vector<2x32xf32>
    %cst_64 = arith.constant dense<0.000000e+00> : vector<2x8xf32>
    %90 = tpu.matmul %89, %0, %cst_64 {dimension_numbers = #tpu.dot_dimension_numbers<[1], [0], [0], [1], [0, 0, 1, 1], [], []>} : vector<2x32xf32>, vector<32x8xf32>, vector<2x8xf32> -> vector<2x8xf32>
    %91 = vector.broadcast %1 : vector<1x8xf32> to vector<2x8xf32>
    %92 = arith.addf %90, %91 : vector<2x8xf32>
    %cst_65 = arith.constant 0.000000e+00 : f32
    %93 = vector.broadcast %cst_65 : f32 to vector<2x8xf32>
    %94 = arith.maximumf %92, %93 : vector<2x8xf32>
    %cst_66 = arith.constant dense<0.000000e+00> : vector<2x1024xf32>
    %95 = tpu.matmul %94, %2, %cst_66 {dimension_numbers = #tpu.dot_dimension_numbers<[1], [0], [0], [1], [0, 0, 1, 1], [], []>} : vector<2x8xf32>, vector<8x1024xf32>, vector<2x1024xf32> -> vector<2x1024xf32>
    %c0_67 = arith.constant 0 : index
    %c7_68 = arith.constant 7 : index
    %c0_69 = arith.constant 0 : index
    %96 = vector.load %arg5[%c0_67, %c7_68, %c0_69] : memref<2x8x1024xf32, #tpu.memory_space<vmem>>, vector<2x1x1024xf32>
    %97 = vector.shape_cast %96 : vector<2x1x1024xf32> to vector<2x1024xf32>
    %98 = arith.mulf %97, %95 : vector<2x1024xf32>
    %99 = arith.addf %87, %98 : vector<2x1024xf32>
    %c0_70 = arith.constant 0 : index
    %c0_71 = arith.constant 0 : index
    %100 = vector.load %arg6[%c0_70, %c0_71] : memref<2x1024xf32, #tpu.memory_space<vmem>>, vector<2x1024xf32>
    tpu.vector_store %arg6[%c0_70, %c0_71], %99 {strides = array<i32>} : memref<2x1024xf32, #tpu.memory_space<vmem>>, vector<2x1024xf32>,
    return
  }
  func.func @transform_0(%arg0: i32) -> (i32, i32, i32) {
    %c0_i32 = arith.constant 0 : i32
    %c0_i32_0 = arith.constant 0 : i32
    %c0_i32_1 = arith.constant 0 : i32
    return %arg0, %c0_i32, %c0_i32_0 : i32, i32, i32
  }
  func.func @transform_1(%arg0: i32) -> (i32, i32) {
    %c0_i32 = arith.constant 0 : i32
    %c0_i32_0 = arith.constant 0 : i32
    %c0_i32_1 = arith.constant 0 : i32
    return %c0_i32, %c0_i32_0 : i32, i32
  }
  func.func @transform_2(%arg0: i32) -> (i32, i32) {
    %c0_i32 = arith.constant 0 : i32
    %c0_i32_0 = arith.constant 0 : i32
    %c0_i32_1 = arith.constant 0 : i32
    return %c0_i32, %c0_i32_0 : i32, i32
  }
  func.func @transform_3(%arg0: i32) -> (i32, i32) {
    %c0_i32 = arith.constant 0 : i32
    %c0_i32_0 = arith.constant 0 : i32
    %c0_i32_1 = arith.constant 0 : i32
    return %c0_i32, %c0_i32_0 : i32, i32
  }
  func.func @transform_4(%arg0: i32) -> (i32, i32, i32) {
    %c0_i32 = arith.constant 0 : i32
    %c0_i32_0 = arith.constant 0 : i32
    %c0_i32_1 = arith.constant 0 : i32
    return %arg0, %c0_i32, %c0_i32_0 : i32, i32, i32
  }
  func.func @transform_5(%arg0: i32) -> (i32, i32) {
    %c0_i32 = arith.constant 0 : i32
    %c0_i32_0 = arith.constant 0 : i32
    return %arg0, %c0_i32 : i32, i32
  }
}

</mosaic_0001>

<bundles_post_ra>
// kernel: tpu_custom_call.1
= control target key start
LH: loop header
LB: loop body
LE: loop exit
PB: predicated region body
PF: predicated region fallthrough
CT: control target
= control target key end

     0   :  { %10 = vsyncpa [#allocation3], 0  ;;  %s2614_s0 = inlined_call_operand.vmem [shape: f32[2,8,32], index: 0, kind: input, shape index: {}]   ;;  %s2615_s1 = inlined_call_operand.vmem [shape: f32[32,8], index: 1, kind: input, shape index: {}]   ;;  %s2616_s2 = inlined_call_operand.vmem [shape: f32[1,8], index: 2, kind: input, shape index: {}]   ;;  %s2617_s3 = inlined_call_operand.hbm [shape: f32[8,1024], index: 3, kind: input, shape index: {}]   ;;  %s2618_s4 = inlined_call_operand.hbm [shape: f32[2,8,1024], index: 4, kind: input, shape index: {}]   ;;  %s2619_s5 = inlined_call_operand.hbm [shape: f32[2,1024], index: 5, kind: output, shape index: {}]  }
   0x1   :  { %11 = vsyncpa [#allocation6], 0 }
   0x2   :  { %12 = vsyncpa [#allocation4], 0  ;;  %s24_s20 = sshll.u32 %s2617_s3, 4  ;;  %s2155_s21 = smov [#allocation2]   ;;  %s25_s20 = int_to_ptr.hbm [resolvable:$true] %s24_s20 }
   0x3   :  { %s26_s22 = sshll.u32 %s2155_s21, 4  ;;  %s34_s25 = sshll.u32 %s2618_s4, 4  ;;  %s27_s22 = int_to_ptr.vmem [resolvable:$true] %s26_s22  ;;  %s35_s25 = int_to_ptr.hbm [resolvable:$true] %s34_s25 }
   0x4   :  { %29 = dma.hbm_to_vmem [thread:$0]  %s25_s20, 1024, %s27_s22, [#allocation3]  }
   0x5   :  { %s2156_s26 = smov [#allocation5]   ;;  %s2157_s28 = smov 1024  }
   0x6   :  { %s36_s27 = sshll.u32 %s2156_s26, 4  ;;  %s2158_s29 = smov 64   ;;  %s37_s27 = int_to_ptr.vmem [resolvable:$true] %s36_s27 }
   0x7   :  { %42 = dma.hbm_to_vmem [thread:$0]  %s35_s25, 2048, %s37_s27, [#allocation6], %s2157_s28, %s2157_s28, %s2158_s29  }
   0x8   :  { %2149 = dma.done.wait [#allocation3], 1024  }
   0x9   :  { %2150 = vsyncadd [#allocation3], 4294966272 }
   0xa   :  { %2151 = dma.done.wait [#allocation6], 2048  }
   0xb   :  { %2152 = vsyncadd [#allocation6], 4294965248  ;;  %v2199_v0 = vld [vmem:[%s2615_s1 + $0x18] sm:$0xff]  ;;  %v2204_v1 = vld [vmem:[%s2615_s1 + $0x10] sm:$0xff]  ;;  %vm72_vm0 = vcmask 1041409   ;;  %vm74_vm1 = vcmask 261120  }
   0xc   :  { %89 = vmatpush.msra.mxu0 %v2199_v0  ;;  %v65_v2 = vld [vmem:[%s2614_s0 + $0x8] sm:$0x1]  ;;  %v64_v4 = vld [vmem:[%s2614_s0] sm:$0x1]  ;;  %v2230_v9 = vld [vmem:[#allocation2 + $0x8] sm:$0xff]  ;;  %vm98_vm2 = vcmask 64512  }
   0xd   :  { %v2213_v3 = vld [vmem:[%s2615_s1 + $0x8] sm:$0xff]  ;;  %v71_v5 = vrot.slane %v65_v2, 7  ;;  %v2222_v6 = vld [vmem:[%s2615_s1] sm:$0xff]  ;;  %v2232_v10 = vld [vmem:[#allocation2 + $0x10] sm:$0xff]  ;;  %137 = vmatpush.msra.mxu2 %v2230_v9  ;;  %vm284_vm3 = vcmask 1040384   ;;  %vm286_vm4 = vcmask 1042434  }
   0xe   :  { %90 = vmatpush.msra.mxu0 %v2204_v1  ;;  %v2228_v8 = vld [vmem:[#allocation2] sm:$0xff]  ;;  %v2236_v11 = vld [vmem:[#allocation2 + $0x30] sm:$0xff]  ;;  %157 = vmatpush.msra.mxu3 %v2232_v10  ;;  %v2242_v13 = vld [vmem:[#allocation2 + $0x18] sm:$0xff]  ;;  %vm288_vm5 = vcmask 1041408   ;;  %vm299_vm6 = vcmask 1043459   ;;  %vm301_vm7 = vcmask 1042433  }
   0xf   :  { %v73_v7 = vsel %vm72_vm0, %v71_v5, %v64_v4  ;;  %117 = vmatpush.msra.mxu1 %v2228_v8  ;;  %v2240_v12 = vld [vmem:[#allocation2 + $0x20] sm:$0xff]  ;;  %v2244_v14 = vld [vmem:[#allocation2 + $0x28] sm:$0xff]  ;;  %v2253_v15 = vld [vmem:[%s2616_s2] ss:$0 sm:$0xff]  ;;  %vm290_vm8 = vcmask 1044484   ;;  %vm303_vm9 = vcmask 1045509  }
  0x10   :  { %91 = vmatpush.msra.mxu0 %v2213_v3  ;;  %197 = vmatpush.msrb.mxu2 %v2240_v12  ;;  %v2256_v19 = vld [vmem:[#allocation2 + $0x38] sm:$0xff]  ;;  %v319_v20 = vld [vmem:[%s2614_s0 + $0x9] sm:$0x1]  ;;  %vm292_vm10 = vcmask 1046534   ;;  %vm305_vm11 = vcmask 1046528   ;;  %vm294_vm12 = vcmask 1045508  }
  0x11   :  { %177 = vmatpush.msrb.mxu1 %v2242_v13  ;;  %217 = vmatpush.msrb.mxu3 %v2244_v14  ;;  %v322_v21 = vrot.slane %v319_v20, 7  ;;  %v318_v22 = vld [vmem:[%s2614_s0 + $0x1] sm:$0x1]  ;;  %vm307_vm13 = vcmask 1046533   ;;  %vm296_vm14 = vcmask 1043456   ;;  %vm309_vm15 = vcmask 1044481  }
  0x12   :  { %92 = vmatpush.msra.mxu0 %v2222_v6  ;;  %v555_v56 = vld [vmem:[%s2614_s0 + $0xa] sm:$0x1]  ;;  %v554_v58 = vld [vmem:[%s2614_s0 + $0x2] sm:$0x1]  ;;  %s1988_s17 = sshll.u32 %s2619_s5, 4  ;;  %s1989_s17 = int_to_ptr.hbm [resolvable:$true] %s1988_s17 }
  0x13   :  { %1999 = vmatmul.msk.f32.vlgmr.msra.gmra.mxu0 %vm74_vm1, %v73_v7  ;;  %v323_v23 = vsel %vm72_vm0, %v322_v21, %v318_v22  ;;  %v558_v57 = vrot.slane %v555_v56, 7  ;;  %v262_v22 = vld [vmem:[#allocation5] ss:$8 sm:$0xf] }
  0x14   :  { %237 = vmatpush.msrb.mxu0 %v2236_v11 }
  0x15   :  { %v559_v59 = vsel %vm72_vm0, %v558_v57, %v554_v58 }
  0x16   :  { %385 = vmatpush.msra.mxu0 %v2230_v9 }
  0x90   :  { %v94_v16 = vpop.f32.mrf.mxu0 }
  0x91   :  { %v95_v17 = vadd.f32 %v2253_v15, %v94_v16 }
  0x93   :  { %v97_v18 = vmax.f32 %v95_v17, 0.0 }
  0x95   :  { %2000 = vmatmul.msk.f32.vlgmr.msra.gmra.mxu1 %vm98_vm2, %v97_v18  ;;  %2001 = vmatmul.msk.f32.vlgmr.msra.gmra.mxu2 %vm98_vm2, %v97_v18 }
  0x96   :  { %2002 = vmatmul.msk.f32.vlgmr.msra.gmra.mxu3 %vm98_vm2, %v97_v18  ;;  %2006 = vmatmul.msk.f32.vlgmr.msrb.gmra.mxu0 %vm98_vm2, %v97_v18 }
  0x97   :  { %338 = vmatpush.msra.mxu2 %v2199_v0  ;;  %257 = vmatpush.msra.mxu1 %v2256_v19 }
  0x98   :  { %365 = vmatpush.msra.mxu3 %v2228_v8  ;;  %465 = vmatpush.msrb.mxu0 %v2244_v14 }
  0x99   :  { %339 = vmatpush.msra.mxu2 %v2204_v1 }
  0x9b   :  { %340 = vmatpush.msra.mxu2 %v2213_v3 }
  0x9d   :  { %2003 = vmatmul.msk.f32.vlgmr.msrb.gmra.mxu1 %vm98_vm2, %v97_v18  ;;  %2004 = vmatmul.msk.f32.vlgmr.msrb.gmra.mxu2 %vm98_vm2, %v97_v18 }
  0x9e   :  { %2005 = vmatmul.msk.f32.vlgmr.msrb.gmra.mxu3 %vm98_vm2, %v97_v18  ;;  %341 = vmatpush.msra.mxu2 %v2222_v6 }
  0x9f   :  { %405 = vmatpush.msrb.mxu1 %v2232_v10  ;;  %445 = vmatpush.msrb.mxu3 %v2240_v12 }
  0xa0   :  { %425 = vmatpush.msrb.mxu2 %v2242_v13 }
  0xa5   :  { %2007 = vmatmul.msk.f32.vlgmr.msra.gmra.mxu1 %vm98_vm2, %v97_v18  ;;  %2008 = vmatmul.msk.f32.vlgmr.msra.gmra.mxu2 %vm74_vm1, %v323_v23  ;;  %v263_v23 = vld [vmem:[#allocation5] ss:$8 sm:$0xf0] }
  0xa6   :  { %485 = vmatpush.msra.mxu1 %v2236_v11  ;;  %505 = vmatpush.msra.mxu2 %v2256_v19 }
 0x112   :  { %v119_v24 = vpop.f32.mrf.mxu1 }
 0x113   :  { %v239_v37 = vpop.f32.mrf.mxu0 }
 0x114   :  { %v282_v43 = vrot.slane %v239_v37, 2 }
 0x118   :  { %v139_v25 = vpop.f32.mrf.mxu2 }
 0x119   :  { %v277_v26 = vrot.slane %v139_v25, 7  ;;  %v159_v27 = vpop.f32.mrf.mxu3  ;;  %v266_v25 = vld [vmem:[#allocation5 + $0x40] ss:$8 sm:$0xf] }
 0x11a   :  { %v179_v28 = vpop.f32.mrf.mxu1  ;;  %v278_v31 = vrot.slane %v159_v27, 6 }
 0x11b   :  { %v285_v29 = vsel %vm284_vm3, %v119_v24, %v277_v26  ;;  %v298_v30 = vsel %vm72_vm0, %v119_v24, %v277_v26  ;;  %v279_v32 = vrot.slane %v179_v28, 5  ;;  %v267_v26 = vld [vmem:[#allocation5 + $0x40] ss:$8 sm:$0xf0] }
 0x11d   :  { %v287_v33 = vsel %vm286_vm4, %v278_v31, %v279_v32  ;;  %v300_v34 = vsel %vm299_vm6, %v278_v31, %v279_v32 }
 0x11e   :  { %v289_v35 = vsel %vm288_vm5, %v285_v29, %v287_v33  ;;  %v302_v36 = vsel %vm301_vm7, %v298_v30, %v300_v34  ;;  %v511_v29 = vld [vmem:[#allocation5 + $0x1] ss:$8 sm:$0xf] }
 0x11f   :  { %v512_v30 = vld [vmem:[#allocation5 + $0x1] ss:$8 sm:$0xf0] }
 0x120   :  { %v199_v38 = vpop.f32.mrf.mxu2  ;;  %v515_v34 = vld [vmem:[#allocation5 + $0x41] ss:$8 sm:$0xf] }
 0x121   :  { %v280_v39 = vrot.slane %v199_v38, 4  ;;  %v219_v40 = vpop.f32.mrf.mxu3  ;;  %v264_v38 = vor.u32 %v263_v23, %v262_v22 }
 0x122   :  { %v281_v41 = vrot.slane %v219_v40, 3  ;;  %v259_v42 = vpop.f32.mrf.mxu1 }
 0x123   :  { %v283_v44 = vrot.slane %v259_v42, 1  ;;  %v268_v42 = vor.u32 %v267_v26, %v266_v25 }
 0x124   :  { %v291_v45 = vsel %vm290_vm8, %v280_v39, %v281_v41  ;;  %v304_v46 = vsel %vm303_vm9, %v280_v39, %v281_v41  ;;  %v513_v41 = vor.u32 %v512_v30, %v511_v29  ;;  %v747_v29 = vld [vmem:[#allocation5 + $0x2] ss:$8 sm:$0xf] }
 0x125   :  { %v293_v47 = vsel %vm292_vm10, %v282_v43, %v283_v44  ;;  %v306_v48 = vsel %vm305_vm11, %v283_v44, %v282_v43 }
 0x126   :  { %v295_v49 = vsel %vm294_vm12, %v291_v45, %v293_v47  ;;  %v308_v50 = vsel %vm307_vm13, %v304_v46, %v306_v48 }
 0x127   :  { %v2299_v51 = vsel %vm296_vm14, %v289_v35, %v295_v49  ;;  %v2302_v52 = vsel %vm309_vm15, %v302_v36, %v308_v50  ;;  %v516_v36 = vld [vmem:[#allocation5 + $0x41] ss:$8 sm:$0xf0] }
 0x128   :  { %v343_v53 = vpop.f32.mrf.mxu2  ;;  %v311_v45 = vrot.slane %v2302_v52, 1  ;;  %v517_v46 = vor.u32 %v516_v36, %v515_v34 }
 0x129   :  { %v344_v54 = vadd.f32 %v2253_v15, %v343_v53  ;;  %v314_v53 = vmul.f32 %v2299_v51, %v264_v38  ;;  %v791_v51 = vld [vmem:[%s2614_s0 + $0xb] sm:$0x1] }
 0x12a   :  { %v315_v57 = vmul.f32 %v311_v45, %v268_v42 }
 0x12b   :  { %v346_v55 = vmax.f32 %v344_v54, 0.0 }
 0x12d   :  { %2009 = vmatmul.msk.f32.vlgmr.msra.gmra.mxu3 %vm98_vm2, %v346_v55  ;;  %2010 = vmatmul.msk.f32.vlgmr.msra.gmra.mxu0 %vm98_vm2, %v346_v55 }
 0x12e   :  { %2011 = vmatmul.msk.f32.vlgmr.msrb.gmra.mxu1 %vm98_vm2, %v346_v55  ;;  %2012 = vmatmul.msk.f32.vlgmr.msrb.gmra.mxu2 %vm98_vm2, %v346_v55 }
 0x12f   :  { %574 = vmatpush.msra.mxu3 %v2199_v0  ;;  %601 = vmatpush.msra.mxu0 %v2228_v8 }
 0x130   :  { %621 = vmatpush.msrb.mxu1 %v2230_v9  ;;  %641 = vmatpush.msrb.mxu2 %v2232_v10 }
 0x131   :  { %575 = vmatpush.msra.mxu3 %v2204_v1 }
 0x133   :  { %576 = vmatpush.msra.mxu3 %v2213_v3 }
 0x135   :  { %2013 = vmatmul.msk.f32.vlgmr.msrb.gmra.mxu3 %vm98_vm2, %v346_v55  ;;  %2014 = vmatmul.msk.f32.vlgmr.msrb.gmra.mxu0 %vm98_vm2, %v346_v55 }
 0x136   :  { %2015 = vmatmul.msk.f32.vlgmr.msra.gmra.mxu1 %vm98_vm2, %v346_v55  ;;  %2016 = vmatmul.msk.f32.vlgmr.msra.gmra.mxu2 %vm98_vm2, %v346_v55 }
 0x137   :  { %577 = vmatpush.msra.mxu3 %v2222_v6  ;;  %681 = vmatpush.msrb.mxu0 %v2240_v12 }
 0x138   :  { %701 = vmatpush.msra.mxu1 %v2244_v14  ;;  %721 = vmatpush.msra.mxu2 %v2236_v11 }
 0x139   :  { %661 = vmatpush.msrb.mxu3 %v2242_v13 }
 0x13d   :  { %2017 = vmatmul.msk.f32.vlgmr.msra.gmra.mxu3 %vm74_vm1, %v559_v59 }
 0x13e   :  { %741 = vmatpush.msra.mxu3 %v2256_v19 }
 0x1aa   :  { %v387_v60 = vpop.f32.mrf.mxu0 }
 0x1ab   :  { %v407_v61 = vpop.f32.mrf.mxu1  ;;  %v526_v62 = vrot.slane %v387_v60, 7 }
 0x1ac   :  { %v527_v7 = vrot.slane %v407_v61, 6 }
 0x1b0   :  { %v367_v63 = vpop.f32.mrf.mxu3 }
 0x1b1   :  { %v533_v2 = vsel %vm284_vm3, %v367_v63, %v526_v62  ;;  %v540_v4 = vsel %vm72_vm0, %v367_v63, %v526_v62  ;;  %v427_v5 = vpop.f32.mrf.mxu2  ;;  %v794_v62 = vrot.slane %v791_v51, 7  ;;  %v790_v63 = vld [vmem:[%s2614_s0 + $0x3] sm:$0x1] }
 0x1b2   :  { %v528_v16 = vrot.slane %v427_v5, 5  ;;  %v467_v24 = vpop.f32.mrf.mxu0 }
 0x1b3   :  { %v487_v27 = vpop.f32.mrf.mxu1  ;;  %v530_v31 = vrot.slane %v467_v24, 3 }
 0x1b4   :  { %v534_v17 = vsel %vm286_vm4, %v527_v7, %v528_v16  ;;  %v541_v18 = vsel %vm299_vm6, %v527_v7, %v528_v16  ;;  %v531_v35 = vrot.slane %v487_v27, 2 }
 0x1b5   :  { %v535_v20 = vsel %vm288_vm5, %v533_v2, %v534_v17  ;;  %v542_v21 = vsel %vm301_vm7, %v540_v4, %v541_v18  ;;  %v795_v2 = vsel %vm72_vm0, %v794_v62, %v790_v63 }
 0x1b8   :  { %v447_v28 = vpop.f32.mrf.mxu3 }
 0x1b9   :  { %v529_v32 = vrot.slane %v447_v28, 4  ;;  %v507_v33 = vpop.f32.mrf.mxu2 }
 0x1ba   :  { %v532_v37 = vrot.slane %v507_v33, 1 }
 0x1bb   :  { %v536_v39 = vsel %vm290_vm8, %v529_v32, %v530_v31  ;;  %v543_v40 = vsel %vm303_vm9, %v529_v32, %v530_v31  ;;  %v748_v32 = vld [vmem:[#allocation5 + $0x2] ss:$8 sm:$0xf0] }
 0x1bc   :  { %v537_v43 = vsel %vm292_vm10, %v531_v35, %v532_v37  ;;  %v544_v44 = vsel %vm305_vm11, %v532_v37, %v531_v35  ;;  %v751_v35 = vld [vmem:[#allocation5 + $0x42] ss:$8 sm:$0xf] }
 0x1bd   :  { %v538_v47 = vsel %vm294_vm12, %v536_v39, %v537_v43  ;;  %v545_v48 = vsel %vm307_vm13, %v543_v40, %v544_v44  ;;  %v752_v37 = vld [vmem:[#allocation5 + $0x42] ss:$8 sm:$0xf0]  ;;  %v749_v40 = vor.u32 %v748_v32, %v747_v29 }
 0x1be   :  { %v539_v49 = vsel %vm296_vm14, %v535_v20, %v538_v47  ;;  %v546_v50 = vsel %vm309_vm15, %v542_v21, %v545_v48 }
 0x1bf   :  { %v547_v54 = vrot.slane %v546_v50, 1  ;;  %v550_v55 = vmul.f32 %v539_v49, %v513_v41 }
 0x1c0   :  { %v579_v56 = vpop.f32.mrf.mxu3 }
 0x1c1   :  { %v551_v58 = vmul.f32 %v547_v54, %v517_v46  ;;  %v2349_v59 = vadd.f32 %v550_v55, %v314_v53  ;;  %v580_v52 = vadd.f32 %v2253_v15, %v579_v56  ;;  %v753_v46 = vor.u32 %v752_v37, %v751_v35 }
 0x1c3   :  { %v2352_v60 = vadd.f32 %v551_v58, %v315_v57  ;;  %v582_v61 = vmax.f32 %v580_v52, 0.0 }
 0x1c5   :  { %2018 = vmatmul.msk.f32.vlgmr.msra.gmra.mxu0 %vm98_vm2, %v582_v61  ;;  %2019 = vmatmul.msk.f32.vlgmr.msrb.gmra.mxu1 %vm98_vm2, %v582_v61 }
 0x1c6   :  { %2020 = vmatmul.msk.f32.vlgmr.msrb.gmra.mxu2 %vm98_vm2, %v582_v61  ;;  %2021 = vmatmul.msk.f32.vlgmr.msrb.gmra.mxu3 %vm98_vm2, %v582_v61 }
 0x1c7   :  { %810 = vmatpush.msra.mxu0 %v2199_v0  ;;  %837 = vmatpush.msrb.mxu1 %v2228_v8 }
 0x1c8   :  { %857 = vmatpush.msrb.mxu2 %v2230_v9  ;;  %877 = vmatpush.msrb.mxu3 %v2232_v10 }
 0x1c9   :  { %811 = vmatpush.msra.mxu0 %v2204_v1 }
 0x1cb   :  { %812 = vmatpush.msra.mxu0 %v2213_v3 }
 0x1cd   :  { %2022 = vmatmul.msk.f32.vlgmr.msrb.gmra.mxu0 %vm98_vm2, %v582_v61  ;;  %2023 = vmatmul.msk.f32.vlgmr.msra.gmra.mxu1 %vm98_vm2, %v582_v61 }
 0x1ce   :  { %2024 = vmatmul.msk.f32.vlgmr.msra.gmra.mxu2 %vm98_vm2, %v582_v61  ;;  %2025 = vmatmul.msk.f32.vlgmr.msra.gmra.mxu3 %vm98_vm2, %v582_v61 }
 0x1cf   :  { %813 = vmatpush.msra.mxu0 %v2222_v6  ;;  %917 = vmatpush.msra.mxu1 %v2240_v12 }
 0x1d0   :  { %937 = vmatpush.msra.mxu2 %v2244_v14  ;;  %957 = vmatpush.msra.mxu3 %v2236_v11 }
 0x1d1   :  { %897 = vmatpush.msrb.mxu0 %v2242_v13 }
 0x1d5   :  { %2026 = vmatmul.msk.f32.vlgmr.msra.gmra.mxu0 %vm74_vm1, %v795_v2 }
 0x1d6   :  { %977 = vmatpush.msra.mxu0 %v2256_v19 }
 0x242   :  { %v603_v4 = vpop.f32.mrf.mxu0  ;;  %v623_v5 = vpop.f32.mrf.mxu1 }
 0x243   :  { %v762_v7 = vrot.slane %v623_v5, 7 }
 0x245   :  { %v769_v16 = vsel %vm284_vm3, %v603_v4, %v762_v7  ;;  %v776_v17 = vsel %vm72_vm0, %v603_v4, %v762_v7 }
 0x249   :  { %v643_v18 = vpop.f32.mrf.mxu2  ;;  %v663_v20 = vpop.f32.mrf.mxu3 }
 0x24a   :  { %v763_v21 = vrot.slane %v643_v18, 6  ;;  %v764_v22 = vrot.slane %v663_v20, 5  ;;  %v683_v23 = vpop.f32.mrf.mxu0  ;;  %v703_v28 = vpop.f32.mrf.mxu1 }
 0x24b   :  { %v765_v30 = vrot.slane %v683_v23, 4  ;;  %v766_v31 = vrot.slane %v703_v28, 3 }
 0x24c   :  { %v770_v24 = vsel %vm286_vm4, %v763_v21, %v764_v22  ;;  %v777_v25 = vsel %vm299_vm6, %v763_v21, %v764_v22 }
 0x24d   :  { %v771_v26 = vsel %vm288_vm5, %v769_v16, %v770_v24  ;;  %v778_v27 = vsel %vm301_vm7, %v776_v17, %v777_v25  ;;  %v772_v42 = vsel %vm290_vm8, %v765_v30, %v766_v31  ;;  %v779_v43 = vsel %vm303_vm9, %v765_v30, %v766_v31  ;;  %v987_v31 = vld [vmem:[#allocation5 + $0x43] ss:$8 sm:$0xf] }
 0x251   :  { %v723_v33 = vpop.f32.mrf.mxu2  ;;  %v743_v34 = vpop.f32.mrf.mxu3 }
 0x252   :  { %v767_v36 = vrot.slane %v723_v33, 2  ;;  %v768_v38 = vrot.slane %v743_v34, 1  ;;  %v815_v39 = vpop.f32.mrf.mxu0  ;;  %v988_v33 = vld [vmem:[#allocation5 + $0x43] ss:$8 sm:$0xf0] }
 0x253   :  { %v816_v41 = vadd.f32 %v2253_v15, %v815_v39 }
 0x254   :  { %v773_v44 = vsel %vm292_vm10, %v767_v36, %v768_v38  ;;  %v780_v45 = vsel %vm305_vm11, %v768_v38, %v767_v36 }
 0x255   :  { %v774_v47 = vsel %vm294_vm12, %v772_v42, %v773_v44  ;;  %v781_v48 = vsel %vm307_vm13, %v779_v43, %v780_v45  ;;  %v818_v49 = vmax.f32 %v816_v41, 0.0  ;;  %v989_v42 = vor.u32 %v988_v33, %v987_v31 }
 0x256   :  { %v775_v50 = vsel %vm296_vm14, %v771_v26, %v774_v47  ;;  %v782_v53 = vsel %vm309_vm15, %v778_v27, %v781_v48  ;;  %v983_v26 = vld [vmem:[#allocation5 + $0x3] ss:$8 sm:$0xf] }
 0x257   :  { %v783_v54 = vrot.slane %v782_v53, 1  ;;  %v786_v55 = vmul.f32 %v775_v50, %v749_v40  ;;  %2027 = vmatmul.msk.f32.vlgmr.msrb.gmra.mxu1 %vm98_vm2, %v818_v49  ;;  %2028 = vmatmul.msk.f32.vlgmr.msrb.gmra.mxu2 %vm98_vm2, %v818_v49  ;;  %v984_v27 = vld [vmem:[#allocation5 + $0x3] ss:$8 sm:$0xf0] }
 0x258   :  { %2029 = vmatmul.msk.f32.vlgmr.msrb.gmra.mxu3 %vm98_vm2, %v818_v49  ;;  %2030 = vmatmul.msk.f32.vlgmr.msrb.gmra.mxu0 %vm98_vm2, %v818_v49  ;;  %v985_v38 = vor.u32 %v984_v27, %v983_v26  ;;  %v1223_v27 = vld [vmem:[#allocation5 + $0x44] ss:$8 sm:$0xf] }
 0x259   :  { %v787_v56 = vmul.f32 %v783_v54, %v753_v46  ;;  %v2402_v57 = vadd.f32 %v786_v55, %v2349_v59  ;;  %1046 = vmatpush.msrb.mxu1 %v2199_v0  ;;  %1073 = vmatpush.msrb.mxu2 %v2228_v8  ;;  %v1027_v59 = vld [vmem:[%s2614_s0 + $0xc] sm:$0x1]  ;;  %v1263_v55 = vld [vmem:[%s2614_s0 + $0xd] sm:$0x1] }
 0x25a   :  { %1093 = vmatpush.msrb.mxu3 %v2230_v9  ;;  %1113 = vmatpush.msrb.mxu0 %v2232_v10  ;;  %v1030_v52 = vrot.slane %v1027_v59, 7 }
 0x25b   :  { %v2409_v58 = vadd.f32 %v787_v56, %v2352_v60  ;;  %1047 = vmatpush.msrb.mxu1 %v2204_v1  ;;  %v1026_v60 = vld [vmem:[%s2614_s0 + $0x4] sm:$0x1]  ;;  %v1266_v56 = vrot.slane %v1263_v55, 7 }
 0x25c   :  { %v1031_v61 = vsel %vm72_vm0, %v1030_v52, %v1026_v60 }
 0x25d   :  { %1048 = vmatpush.msrb.mxu1 %v2213_v3 }
 0x25f   :  { %2031 = vmatmul.msk.f32.vlgmr.msra.gmra.mxu1 %vm98_vm2, %v818_v49  ;;  %2032 = vmatmul.msk.f32.vlgmr.msra.gmra.mxu2 %vm98_vm2, %v818_v49 }
 0x260   :  { %2033 = vmatmul.msk.f32.vlgmr.msra.gmra.mxu3 %vm98_vm2, %v818_v49  ;;  %2034 = vmatmul.msk.f32.vlgmr.msra.gmra.mxu0 %vm98_vm2, %v818_v49 }
 0x261   :  { %1049 = vmatpush.msrb.mxu1 %v2222_v6  ;;  %1153 = vmatpush.msra.mxu2 %v2240_v12 }
 0x262   :  { %1173 = vmatpush.msra.mxu3 %v2244_v14  ;;  %1193 = vmatpush.msra.mxu0 %v2236_v11 }
 0x263   :  { %1133 = vmatpush.msra.mxu1 %v2242_v13 }
 0x267   :  { %2035 = vmatmul.msk.f32.vlgmr.msrb.gmra.mxu1 %vm74_vm1, %v1031_v61 }
 0x268   :  { %1213 = vmatpush.msrb.mxu1 %v2256_v19 }
 0x2d4   :  { %v839_v51 = vpop.f32.mrf.mxu1 }
 0x2d5   :  { %v899_v62 = vpop.f32.mrf.mxu0 }
 0x2d6   :  { %v1000_v5 = vrot.slane %v899_v62, 5 }
 0x2da   :  { %v859_v63 = vpop.f32.mrf.mxu2 }
 0x2db   :  { %v998_v2 = vrot.slane %v859_v63, 7  ;;  %v879_v4 = vpop.f32.mrf.mxu3 }
 0x2dc   :  { %v999_v7 = vrot.slane %v879_v4, 6  ;;  %v919_v16 = vpop.f32.mrf.mxu1 }
 0x2dd   :  { %v1005_v17 = vsel %vm284_vm3, %v839_v51, %v998_v2  ;;  %v1012_v18 = vsel %vm72_vm0, %v839_v51, %v998_v2  ;;  %v979_v24 = vpop.f32.mrf.mxu0  ;;  %v1001_v28 = vrot.slane %v919_v16, 4 }
 0x2de   :  { %v1006_v20 = vsel %vm286_vm4, %v999_v7, %v1000_v5  ;;  %v1013_v21 = vsel %vm299_vm6, %v999_v7, %v1000_v5  ;;  %v1004_v32 = vrot.slane %v979_v24, 1  ;;  %v1220_v24 = vld [vmem:[#allocation5 + $0x4] ss:$8 sm:$0xf0] }
 0x2df   :  { %v1007_v22 = vsel %vm288_vm5, %v1005_v17, %v1006_v20  ;;  %v1014_v23 = vsel %vm301_vm7, %v1012_v18, %v1013_v21  ;;  %v1219_v21 = vld [vmem:[#allocation5 + $0x4] ss:$8 sm:$0xf] }
 0x2e0   :  { %v1221_v31 = vor.u32 %v1220_v24, %v1219_v21 }
 0x2e2   :  { %v939_v25 = vpop.f32.mrf.mxu2 }
 0x2e3   :  { %v1002_v29 = vrot.slane %v939_v25, 3  ;;  %v959_v30 = vpop.f32.mrf.mxu3 }
 0x2e4   :  { %v1003_v34 = vrot.slane %v959_v30, 2  ;;  %v1051_v35 = vpop.f32.mrf.mxu1 }
 0x2e5   :  { %v1008_v36 = vsel %vm290_vm8, %v1001_v28, %v1002_v29  ;;  %v1015_v37 = vsel %vm303_vm9, %v1001_v28, %v1002_v29  ;;  %v1052_v39 = vadd.f32 %v2253_v15, %v1051_v35  ;;  %v1224_v29 = vld [vmem:[#allocation5 + $0x44] ss:$8 sm:$0xf0] }
 0x2e6   :  { %v1009_v40 = vsel %vm292_vm10, %v1003_v34, %v1004_v32  ;;  %v1016_v41 = vsel %vm305_vm11, %v1004_v32, %v1003_v34 }
 0x2e7   :  { %v1010_v43 = vsel %vm294_vm12, %v1008_v36, %v1009_v40  ;;  %v1017_v44 = vsel %vm307_vm13, %v1015_v37, %v1016_v41  ;;  %v1054_v45 = vmax.f32 %v1052_v39, 0.0  ;;  %v1225_v36 = vor.u32 %v1224_v29, %v1223_v27 }
 0x2e8   :  { %v1011_v46 = vsel %vm296_vm14, %v1007_v22, %v1010_v43  ;;  %v1018_v47 = vsel %vm309_vm15, %v1014_v23, %v1017_v44 }
 0x2e9   :  { %v1019_v48 = vrot.slane %v1018_v47, 1  ;;  %v1022_v49 = vmul.f32 %v1011_v46, %v985_v38  ;;  %2036 = vmatmul.msk.f32.vlgmr.msrb.gmra.mxu2 %vm98_vm2, %v1054_v45  ;;  %2037 = vmatmul.msk.f32.vlgmr.msrb.gmra.mxu3 %vm98_vm2, %v1054_v45 }
 0x2ea   :  { %2038 = vmatmul.msk.f32.vlgmr.msrb.gmra.mxu0 %vm98_vm2, %v1054_v45  ;;  %2039 = vmatmul.msk.f32.vlgmr.msra.gmra.mxu1 %vm98_vm2, %v1054_v45 }
 0x2eb   :  { %v1023_v50 = vmul.f32 %v1019_v48, %v989_v42  ;;  %v1024_v53 = vadd.f32 %v1022_v49, %v2402_v57  ;;  %1282 = vmatpush.msrb.mxu2 %v2199_v0  ;;  %1309 = vmatpush.msrb.mxu3 %v2228_v8  ;;  %v1262_v57 = vld [vmem:[%s2614_s0 + $0x5] sm:$0x1]  ;;  %v1499_v49 = vld [vmem:[%s2614_s0 + $0xe] sm:$0x1] }
 0x2ec   :  { %1329 = vmatpush.msrb.mxu0 %v2230_v9  ;;  %1349 = vmatpush.msra.mxu1 %v2232_v10 }
 0x2ed   :  { %v1025_v54 = vadd.f32 %v1023_v50, %v2409_v58  ;;  %1283 = vmatpush.msrb.mxu2 %v2204_v1  ;;  %v1267_v58 = vsel %vm72_vm0, %v1266_v56, %v1262_v57  ;;  %v1502_v50 = vrot.slane %v1499_v49, 7  ;;  %v1691_v49 = vld [vmem:[#allocation5 + $0x6] ss:$8 sm:$0xf] }
 0x2ef   :  { %1284 = vmatpush.msrb.mxu2 %v2213_v3 }
 0x2f1   :  { %2040 = vmatmul.msk.f32.vlgmr.msra.gmra.mxu2 %vm98_vm2, %v1054_v45  ;;  %2041 = vmatmul.msk.f32.vlgmr.msra.gmra.mxu3 %vm98_vm2, %v1054_v45 }
 0x2f2   :  { %2042 = vmatmul.msk.f32.vlgmr.msra.gmra.mxu0 %vm98_vm2, %v1054_v45  ;;  %2043 = vmatmul.msk.f32.vlgmr.msrb.gmra.mxu1 %vm98_vm2, %v1054_v45 }
 0x2f3   :  { %1285 = vmatpush.msrb.mxu2 %v2222_v6  ;;  %1389 = vmatpush.msra.mxu3 %v2240_v12 }
 0x2f4   :  { %1409 = vmatpush.msra.mxu0 %v2244_v14  ;;  %1429 = vmatpush.msrb.mxu1 %v2236_v11 }
 0x2f5   :  { %1369 = vmatpush.msra.mxu2 %v2242_v13 }
 0x2f9   :  { %2044 = vmatmul.msk.f32.vlgmr.msrb.gmra.mxu2 %vm74_vm1, %v1267_v58 }
 0x2fa   :  { %1449 = vmatpush.msrb.mxu2 %v2256_v19 }
 0x367   :  { %v1115_v59 = vpop.f32.mrf.mxu0  ;;  %v1135_v52 = vpop.f32.mrf.mxu1 }
 0x368   :  { %v1235_v60 = vrot.slane %v1115_v59, 6  ;;  %v1236_v61 = vrot.slane %v1135_v52, 5 }
 0x36a   :  { %v1242_v2 = vsel %vm286_vm4, %v1235_v60, %v1236_v61  ;;  %v1249_v4 = vsel %vm299_vm6, %v1235_v60, %v1236_v61 }
 0x36c   :  { %v1075_v51 = vpop.f32.mrf.mxu2  ;;  %v1095_v62 = vpop.f32.mrf.mxu3 }
 0x36d   :  { %v1234_v63 = vrot.slane %v1095_v62, 7 }
 0x36f   :  { %v1241_v5 = vsel %vm284_vm3, %v1075_v51, %v1234_v63  ;;  %v1248_v7 = vsel %vm72_vm0, %v1075_v51, %v1234_v63  ;;  %v1195_v18 = vpop.f32.mrf.mxu0  ;;  %v1215_v20 = vpop.f32.mrf.mxu1  ;;  %v1455_v63 = vld [vmem:[#allocation5 + $0x5] ss:$8 sm:$0xf] }
 0x370   :  { %v1243_v16 = vsel %vm288_vm5, %v1241_v5, %v1242_v2  ;;  %v1250_v17 = vsel %vm301_vm7, %v1248_v7, %v1249_v4  ;;  %v1239_v22 = vrot.slane %v1195_v18, 2  ;;  %v1240_v23 = vrot.slane %v1215_v20, 1  ;;  %v1456_v2 = vld [vmem:[#allocation5 + $0x5] ss:$8 sm:$0xf0] }
 0x371   :  { %v1459_v7 = vld [vmem:[#allocation5 + $0x45] ss:$8 sm:$0xf]  ;;  %v1457_v27 = vor.u32 %v1456_v2, %v1455_v63 }
 0x372   :  { %v1245_v32 = vsel %vm292_vm10, %v1239_v22, %v1240_v23  ;;  %v1252_v33 = vsel %vm305_vm11, %v1240_v23, %v1239_v22  ;;  %v1460_v20 = vld [vmem:[#allocation5 + $0x45] ss:$8 sm:$0xf0] }
 0x374   :  { %v1155_v25 = vpop.f32.mrf.mxu2  ;;  %v1175_v26 = vpop.f32.mrf.mxu3 }
 0x375   :  { %v1237_v28 = vrot.slane %v1155_v25, 4  ;;  %v1238_v30 = vrot.slane %v1175_v26, 3 }
 0x377   :  { %v1244_v34 = vsel %vm290_vm8, %v1237_v28, %v1238_v30  ;;  %v1251_v35 = vsel %vm303_vm9, %v1237_v28, %v1238_v30  ;;  %v1461_v28 = vor.u32 %v1460_v20, %v1459_v7 }
 0x378   :  { %v1246_v37 = vsel %vm294_vm12, %v1244_v34, %v1245_v32  ;;  %v1253_v38 = vsel %vm307_vm13, %v1251_v35, %v1252_v33 }
 0x379   :  { %v1247_v39 = vsel %vm296_vm14, %v1243_v16, %v1246_v37  ;;  %v1254_v40 = vsel %vm309_vm15, %v1250_v17, %v1253_v38 }
 0x37a   :  { %v1255_v41 = vrot.slane %v1254_v40, 1  ;;  %v1258_v42 = vmul.f32 %v1247_v39, %v1221_v31 }
 0x37c   :  { %v1259_v43 = vmul.f32 %v1255_v41, %v1225_v36  ;;  %v2490_v44 = vadd.f32 %v1258_v42, %v1024_v53  ;;  %v1287_v45 = vpop.f32.mrf.mxu2  ;;  %v1498_v53 = vld [vmem:[%s2614_s0 + $0x6] sm:$0x1] }
 0x37d   :  { %v1288_v46 = vadd.f32 %v2253_v15, %v1287_v45 }
 0x37e   :  { %v2493_v47 = vadd.f32 %v1259_v43, %v1025_v54  ;;  %v1503_v54 = vsel %vm72_vm0, %v1502_v50, %v1498_v53  ;;  %v1692_v50 = vld [vmem:[#allocation5 + $0x6] ss:$8 sm:$0xf0] }
 0x37f   :  { %v1290_v48 = vmax.f32 %v1288_v46, 0.0 }
 0x381   :  { %2045 = vmatmul.msk.f32.vlgmr.msrb.gmra.mxu3 %vm98_vm2, %v1290_v48  ;;  %2046 = vmatmul.msk.f32.vlgmr.msrb.gmra.mxu0 %vm98_vm2, %v1290_v48 }
 0x382   :  { %2047 = vmatmul.msk.f32.vlgmr.msra.gmra.mxu1 %vm98_vm2, %v1290_v48  ;;  %2048 = vmatmul.msk.f32.vlgmr.msra.gmra.mxu2 %vm98_vm2, %v1290_v48 }
 0x383   :  { %1518 = vmatpush.msrb.mxu3 %v2199_v0  ;;  %1545 = vmatpush.msrb.mxu0 %v2228_v8 }
 0x384   :  { %1565 = vmatpush.msra.mxu1 %v2230_v9  ;;  %1585 = vmatpush.msra.mxu2 %v2232_v10 }
 0x385   :  { %1519 = vmatpush.msrb.mxu3 %v2204_v1 }
 0x387   :  { %1520 = vmatpush.msrb.mxu3 %v2213_v3 }
 0x389   :  { %2049 = vmatmul.msk.f32.vlgmr.msra.gmra.mxu3 %vm98_vm2, %v1290_v48  ;;  %2050 = vmatmul.msk.f32.vlgmr.msra.gmra.mxu0 %vm98_vm2, %v1290_v48 }
 0x38a   :  { %2051 = vmatmul.msk.f32.vlgmr.msrb.gmra.mxu1 %vm98_vm2, %v1290_v48  ;;  %2052 = vmatmul.msk.f32.vlgmr.msrb.gmra.mxu2 %vm98_vm2, %v1290_v48 }
 0x38b   :  { %1521 = vmatpush.msrb.mxu3 %v2222_v6  ;;  %1625 = vmatpush.msra.mxu0 %v2240_v12 }
 0x38c   :  { %1645 = vmatpush.msrb.mxu1 %v2244_v14  ;;  %1665 = vmatpush.msrb.mxu2 %v2236_v11 }
 0x38d   :  { %1605 = vmatpush.msra.mxu3 %v2242_v13 }
 0x391   :  { %2053 = vmatmul.msk.f32.vlgmr.msrb.gmra.mxu3 %vm74_vm1, %v1503_v54 }
 0x392   :  { %1685 = vmatpush.msrb.mxu3 %v2256_v19 }
 0x3fe   :  { %v1331_v55 = vpop.f32.mrf.mxu0 }
 0x3ff   :  { %v1351_v56 = vpop.f32.mrf.mxu1  ;;  %v1470_v57 = vrot.slane %v1331_v55, 7  ;;  %v1696_v55 = vld [vmem:[#allocation5 + $0x46] ss:$8 sm:$0xf0] }
 0x400   :  { %v1471_v4 = vrot.slane %v1351_v56, 6 }
 0x404   :  { %v1311_v58 = vpop.f32.mrf.mxu3 }
 0x405   :  { %v1477_v59 = vsel %vm284_vm3, %v1311_v58, %v1470_v57  ;;  %v1484_v52 = vsel %vm72_vm0, %v1311_v58, %v1470_v57  ;;  %v1371_v60 = vpop.f32.mrf.mxu2 }
 0x406   :  { %v1472_v61 = vrot.slane %v1371_v60, 5  ;;  %v1411_v51 = vpop.f32.mrf.mxu0 }
 0x407   :  { %v1431_v62 = vpop.f32.mrf.mxu1  ;;  %v1474_v16 = vrot.slane %v1411_v51, 3 }
 0x408   :  { %v1478_v21 = vsel %vm286_vm4, %v1471_v4, %v1472_v61  ;;  %v1485_v22 = vsel %vm299_vm6, %v1471_v4, %v1472_v61  ;;  %v1475_v23 = vrot.slane %v1431_v62, 2 }
 0x409   :  { %v1479_v31 = vsel %vm288_vm5, %v1477_v59, %v1478_v21  ;;  %v1486_v32 = vsel %vm301_vm7, %v1484_v52, %v1485_v22 }
 0x40c   :  { %v1391_v5 = vpop.f32.mrf.mxu3 }
 0x40d   :  { %v1473_v17 = vrot.slane %v1391_v5, 4  ;;  %v1451_v18 = vpop.f32.mrf.mxu2 }
 0x40e   :  { %v1476_v24 = vrot.slane %v1451_v18, 1 }
 0x40f   :  { %v1480_v25 = vsel %vm290_vm8, %v1473_v17, %v1474_v16  ;;  %v1487_v26 = vsel %vm303_vm9, %v1473_v17, %v1474_v16 }
 0x410   :  { %v1481_v29 = vsel %vm292_vm10, %v1475_v23, %v1476_v24  ;;  %v1488_v30 = vsel %vm305_vm11, %v1476_v24, %v1475_v23 }
 0x411   :  { %v1482_v33 = vsel %vm294_vm12, %v1480_v25, %v1481_v29  ;;  %v1489_v34 = vsel %vm307_vm13, %v1487_v26, %v1488_v30 }
 0x412   :  { %v1483_v35 = vsel %vm296_vm14, %v1479_v31, %v1482_v33  ;;  %v1490_v36 = vsel %vm309_vm15, %v1486_v32, %v1489_v34 }
 0x413   :  { %v1491_v37 = vrot.slane %v1490_v36, 1  ;;  %v1494_v38 = vmul.f32 %v1483_v35, %v1457_v27  ;;  %v1927_v36 = vld [vmem:[#allocation5 + $0x7] ss:$8 sm:$0xf] }
 0x414   :  { %v1523_v39 = vpop.f32.mrf.mxu3 }
 0x415   :  { %v1495_v40 = vmul.f32 %v1491_v37, %v1461_v28  ;;  %v2538_v41 = vadd.f32 %v1494_v38, %v2490_v44  ;;  %v1524_v42 = vadd.f32 %v2253_v15, %v1523_v39  ;;  %v1735_v44 = vld [vmem:[%s2614_s0 + $0xf] sm:$0x1] }
 0x416   :  { %v1928_v37 = vld [vmem:[#allocation5 + $0x7] ss:$8 sm:$0xf0] }
 0x417   :  { %v2542_v43 = vadd.f32 %v1495_v40, %v2493_v47  ;;  %v1526_v45 = vmax.f32 %v1524_v42, 0.0  ;;  %v1931_v40 = vld [vmem:[#allocation5 + $0x47] ss:$8 sm:$0xf] }
 0x419   :  { %2054 = vmatmul.msk.f32.vlgmr.msrb.gmra.mxu0 %vm98_vm2, %v1526_v45  ;;  %2055 = vmatmul.msk.f32.vlgmr.msra.gmra.mxu1 %vm98_vm2, %v1526_v45 }
 0x41a   :  { %2056 = vmatmul.msk.f32.vlgmr.msra.gmra.mxu2 %vm98_vm2, %v1526_v45  ;;  %2057 = vmatmul.msk.f32.vlgmr.msra.gmra.mxu3 %vm98_vm2, %v1526_v45 }
 0x41b   :  { %1754 = vmatpush.msrb.mxu0 %v2199_v0  ;;  %1801 = vmatpush.msra.mxu2 %v2230_v9  ;;  %v1738_v0 = vrot.slane %v1735_v44, 7 }
 0x41c   :  { %1821 = vmatpush.msra.mxu3 %v2232_v10  ;;  %1781 = vmatpush.msra.mxu1 %v2228_v8 }
 0x41d   :  { %1755 = vmatpush.msrb.mxu0 %v2204_v1  ;;  %v1734_v1 = vld [vmem:[%s2614_s0 + $0x7] sm:$0x1]  ;;  %s2159_s0 = smov [#allocation7]  }
 0x41e   :  { %s1986_s15 = sshll.u32 %s2159_s0, 4  ;;  %s1987_s15 = int_to_ptr.vmem [resolvable:$true] %s1986_s15 }
 0x41f   :  { %1756 = vmatpush.msrb.mxu0 %v2213_v3  ;;  %v1739_v3 = vsel %vm72_vm0, %v1738_v0, %v1734_v1  ;;  %v1932_v0 = vld [vmem:[#allocation5 + $0x47] ss:$8 sm:$0xf0] }
 0x421   :  { %2058 = vmatmul.msk.f32.vlgmr.msra.gmra.mxu0 %vm98_vm2, %v1526_v45  ;;  %2059 = vmatmul.msk.f32.vlgmr.msrb.gmra.mxu1 %vm98_vm2, %v1526_v45 }
 0x422   :  { %2060 = vmatmul.msk.f32.vlgmr.msrb.gmra.mxu2 %vm98_vm2, %v1526_v45  ;;  %2061 = vmatmul.msk.f32.vlgmr.msrb.gmra.mxu3 %vm98_vm2, %v1526_v45 }
 0x423   :  { %1757 = vmatpush.msrb.mxu0 %v2222_v6  ;;  %1881 = vmatpush.msrb.mxu2 %v2244_v14 }
 0x424   :  { %1901 = vmatpush.msrb.mxu3 %v2236_v11  ;;  %1861 = vmatpush.msrb.mxu1 %v2240_v12  ;;  %v1695_v11 = vld [vmem:[#allocation5 + $0x46] ss:$8 sm:$0xf] }
 0x425   :  { %1841 = vmatpush.msra.mxu0 %v2242_v13  ;;  %v1697_v63 = vor.u32 %v1696_v55, %v1695_v11 }
 0x429   :  { %2062 = vmatmul.msk.f32.vlgmr.msrb.gmra.mxu0 %vm74_vm1, %v1739_v3 }
 0x42a   :  { %1921 = vmatpush.msrb.mxu0 %v2256_v19  ;;  %v1693_v19 = vor.u32 %v1692_v50, %v1691_v49 }
 0x496   :  { %v1547_v8 = vpop.f32.mrf.mxu0  ;;  %v1567_v6 = vpop.f32.mrf.mxu1 }
 0x497   :  { %v1706_v13 = vrot.slane %v1567_v6, 7 }
 0x499   :  { %v1713_v58 = vsel %vm284_vm3, %v1547_v8, %v1706_v13  ;;  %v1720_v51 = vsel %vm72_vm0, %v1547_v8, %v1706_v13 }
 0x49d   :  { %v1587_v9 = vpop.f32.mrf.mxu2  ;;  %v1607_v10 = vpop.f32.mrf.mxu3 }
 0x49e   :  { %v1627_v46 = vpop.f32.mrf.mxu0  ;;  %v1707_v47 = vrot.slane %v1587_v9, 6  ;;  %v1708_v48 = vrot.slane %v1607_v10, 5  ;;  %v1647_v14 = vpop.f32.mrf.mxu1 }
 0x49f   :  { %v1709_v53 = vrot.slane %v1627_v46, 4  ;;  %v1710_v54 = vrot.slane %v1647_v14, 3  ;;  %v1929_v46 = vor.u32 %v1928_v37, %v1927_v36 }
 0x4a0   :  { %v1714_v12 = vsel %vm286_vm4, %v1707_v47, %v1708_v48  ;;  %v1721_v59 = vsel %vm299_vm6, %v1707_v47, %v1708_v48  ;;  %v1933_v47 = vor.u32 %v1932_v0, %v1931_v40 }
 0x4a1   :  { %v1715_v62 = vsel %vm288_vm5, %v1713_v58, %v1714_v12  ;;  %v1716_v4 = vsel %vm290_vm8, %v1709_v53, %v1710_v54  ;;  %v1723_v5 = vsel %vm303_vm9, %v1709_v53, %v1710_v54  ;;  %v1722_v17 = vsel %vm301_vm7, %v1720_v51, %v1721_v59 }
 0x4a5   :  { %v1667_v56 = vpop.f32.mrf.mxu2  ;;  %v1687_v57 = vpop.f32.mrf.mxu3 }
 0x4a6   :  { %v1711_v52 = vrot.slane %v1667_v56, 2  ;;  %v1712_v60 = vrot.slane %v1687_v57, 1  ;;  %v1759_v61 = vpop.f32.mrf.mxu0 }
 0x4a7   :  { %v1760_v2 = vadd.f32 %v2253_v15, %v1759_v61 }
 0x4a8   :  { %v1717_v7 = vsel %vm292_vm10, %v1711_v52, %v1712_v60  ;;  %v1724_v16 = vsel %vm305_vm11, %v1712_v60, %v1711_v52 }
 0x4a9   :  { %v1718_v18 = vsel %vm294_vm12, %v1716_v4, %v1717_v7  ;;  %v1725_v20 = vsel %vm307_vm13, %v1723_v5, %v1724_v16  ;;  %v1762_v21 = vmax.f32 %v1760_v2, 0.0 }
 0x4aa   :  { %v1719_v22 = vsel %vm296_vm14, %v1715_v62, %v1718_v18  ;;  %v1726_v23 = vsel %vm309_vm15, %v1722_v17, %v1725_v20 }
 0x4ab   :  { %v1727_v15 = vrot.slane %v1726_v23, 1  ;;  %v1730_v24 = vmul.f32 %v1719_v22, %v1693_v19  ;;  %2063 = vmatmul.msk.f32.vlgmr.msra.gmra.mxu1 %vm98_vm2, %v1762_v21  ;;  %2064 = vmatmul.msk.f32.vlgmr.msra.gmra.mxu2 %vm98_vm2, %v1762_v21 }
 0x4ac   :  { %2065 = vmatmul.msk.f32.vlgmr.msra.gmra.mxu3 %vm98_vm2, %v1762_v21  ;;  %2066 = vmatmul.msk.f32.vlgmr.msra.gmra.mxu0 %vm98_vm2, %v1762_v21 }
 0x4ad   :  { %v1731_v25 = vmul.f32 %v1727_v15, %v1697_v63  ;;  %v1732_v26 = vadd.f32 %v1730_v24, %v2538_v41 }
 0x4af   :  { %v1733_v27 = vadd.f32 %v1731_v25, %v2542_v43 }
 0x4b3   :  { %2067 = vmatmul.msk.f32.vlgmr.msrb.gmra.mxu1 %vm98_vm2, %v1762_v21  ;;  %2068 = vmatmul.msk.f32.vlgmr.msrb.gmra.mxu2 %vm98_vm2, %v1762_v21 }
 0x4b4   :  { %2069 = vmatmul.msk.f32.vlgmr.msrb.gmra.mxu3 %vm98_vm2, %v1762_v21  ;;  %2070 = vmatmul.msk.f32.vlgmr.msrb.gmra.mxu0 %vm98_vm2, %v1762_v21 }
 0x528   :  { %v1783_v28 = vpop.f32.mrf.mxu1 }
 0x529   :  { %v1843_v29 = vpop.f32.mrf.mxu0 }
 0x52a   :  { %v1944_v38 = vrot.slane %v1843_v29, 5 }
 0x52e   :  { %v1803_v30 = vpop.f32.mrf.mxu2 }
 0x52f   :  { %v1823_v31 = vpop.f32.mrf.mxu3  ;;  %v1942_v32 = vrot.slane %v1803_v30, 7 }
 0x530   :  { %v1943_v33 = vrot.slane %v1823_v31, 6  ;;  %v1863_v34 = vpop.f32.mrf.mxu1 }
 0x531   :  { %v1923_v35 = vpop.f32.mrf.mxu0  ;;  %v1949_v41 = vsel %vm284_vm3, %v1783_v28, %v1942_v32  ;;  %v1956_v42 = vsel %vm72_vm0, %v1783_v28, %v1942_v32  ;;  %v1945_v43 = vrot.slane %v1863_v34, 4 }
 0x532   :  { %v1950_v1 = vsel %vm286_vm4, %v1943_v33, %v1944_v38  ;;  %v1957_v3 = vsel %vm299_vm6, %v1943_v33, %v1944_v38  ;;  %v1948_v8 = vrot.slane %v1923_v35, 1 }
 0x533   :  { %v1951_v49 = vsel %vm288_vm5, %v1949_v41, %v1950_v1  ;;  %v1958_v13 = vsel %vm301_vm7, %v1956_v42, %v1957_v3 }
 0x536   :  { %v1883_v39 = vpop.f32.mrf.mxu2 }
 0x537   :  { %v1946_v45 = vrot.slane %v1883_v39, 3  ;;  %v1903_v44 = vpop.f32.mrf.mxu3 }
 0x538   :  { %v1947_v6 = vrot.slane %v1903_v44, 2 }
 0x539   :  { %v1952_v9 = vsel %vm290_vm8, %v1945_v43, %v1946_v45  ;;  %v1959_v10 = vsel %vm303_vm9, %v1945_v43, %v1946_v45 }
 0x53a   :  { %v1953_v48 = vsel %vm292_vm10, %v1947_v6, %v1948_v8  ;;  %v1960_v14 = vsel %vm305_vm11, %v1948_v8, %v1947_v6 }
 0x53b   :  { %v1954_v50 = vsel %vm294_vm12, %v1952_v9, %v1953_v48  ;;  %v1961_v11 = vsel %vm307_vm13, %v1959_v10, %v1960_v14 }
 0x53c   :  { %v1955_v12 = vsel %vm296_vm14, %v1951_v49, %v1954_v50  ;;  %v1962_v53 = vsel %vm309_vm15, %v1958_v13, %v1961_v11 }
 0x53d   :  { %v1963_v54 = vrot.slane %v1962_v53, 1  ;;  %v1966_v55 = vmul.f32 %v1955_v12, %v1929_v46 }
 0x53f   :  { %v1967_v56 = vmul.f32 %v1963_v54, %v1933_v47  ;;  %v1968_v57 = vadd.f32 %v1966_v55, %v1732_v26 }
 0x541   :  { %v1969_v19 = vadd.f32 %v1967_v56, %v1733_v27  ;;  %1972 = vst [vmem:[#allocation1] ss:$2 sm:$0xff] %v1968_v57 }
 0x543   :  { %1974 = vst [vmem:[#allocation1 + $0x1] ss:$2 sm:$0xff] %v1969_v19 }
 0x54a   :  { %v1975_v58 = vld [vmem:[#allocation1] sm:$0xff]  ;;  %v1976_v59 = vld [vmem:[#allocation1 + $0x8] sm:$0xff] }
 0x54b   :  { %1979 = vst [vmem:[#allocation7] sm:$0xff] %v1975_v58 }
 0x54c   :  { %1980 = vst [vmem:[#allocation7 + $0x8] sm:$0xff] %v1976_v59 }
 0x54d   :  { %1991 = dma.vmem_to_hbm [thread:$0]  %s1987_s15, 256, %s1989_s17, [#allocation4]  }
 0x54e   :  { %2153 = dma.done.wait [#allocation4], 256  }
 0x54f   :  { %2154 = vsyncadd [#allocation4], 4294967040 }
 0x550   :  { %1996 = vsyncpa [#allocation3], 1 }
 0x551   :  { %1997 = vsyncpa [#allocation6], 1 }
 0x552   :  { %1998 = vsyncpa [#allocation4], 1 }

</bundles_post_ra>
